<compile_context>
chip_gen: v7x
topology: tpu7x:2x2x1
jax: 0.10.0
libtpu: 0.0.40
codegen_flags: <defaults>
</compile_context>

<pallas_src>
import jax
import jax.numpy as jnp
from jax.experimental import pallas as pl
from jax.experimental.pallas import tpu as pltpu

GROUP = 32                    # samples packed per lane-dense row
IN_F = 8                      # input features  (LunarLander-v2 observation)
OUT_F = 4                     # output features (actions)
PACK_IN = GROUP * IN_F        # 256 lanes
PACK_OUT = GROUP * OUT_F      # 128 lanes


def nn_kernel(x_ref, w_ref, b_ref, s_ref, o_ref):
    # x_ref: (TB, 256)  -- 32 samples x 8 features per row, lane-dense
    # w_ref: (256, 128) -- block-diagonal folded weight (32 copies of the 8x4 map)
    # b_ref: (1, 128)   -- folded bias tiled 32x
    # s_ref: (128, 128) -- 0/1 block-diagonal (4x4 ones): per-sample group-sum matrix
    x = x_ref[...]
    logits = jnp.dot(x, w_ref[...],
                     preferred_element_type=jnp.float32) + b_ref[...]      # (TB, 128)

    # Stability shift: subtract the per-packed-row max.  It is the *same* constant for
    # all 4 logits of any given sample, so the softmax value is mathematically
    # unchanged (softmax is shift-invariant per sample).  The clamp keeps exp() and
    # the reciprocal in normal f32 range even if co-packed samples have wildly
    # different logit scales (results only deviate when a sample's logits all sit
    # more than 60 below the packed-row max -- never the case for this policy head).
    m = jnp.max(logits, axis=-1, keepdims=True)                            # (TB, 1)
    e = jnp.exp(jnp.maximum(logits - m, -60.0))                            # (TB, 128)

    # Per-sample (aligned 4-lane group) denominator, broadcast back to the group's
    # 4 lanes via the block-diagonal ones matmul -- stays on the MXU, no narrow
    # 4-lane cross-lane reductions.
    denom = jnp.dot(e, s_ref[...], preferred_element_type=jnp.float32)     # (TB, 128)
    o_ref[...] = (e * pl.reciprocal(denom, approx=True)).astype(o_ref.dtype)


def _round_up(n: int, m: int) -> int:
    return ((n + m - 1) // m) * m


def nn_forward(x, w1, b1, w2, b2, *, tbg_max=4096):
    """Forward pass.  x: (B, 8) f32.  w1: (32, 8), b1: (32,), w2: (4, 32), b2: (4,)."""
    # TODO(synk): training-mode Dropout(0.5) (prng mask + 2x scale on the hidden
    # layer) is not implemented; the folding below is eval/inference semantics only.
    B = x.shape[0]
    x = x.astype(jnp.float32)

    # Eval-mode algebraic folding: Linear(8,32) -> Dropout(identity) -> Linear(32,4).
    w_fold = (w2 @ w1).astype(jnp.float32).T                 # (8, 4)
    b_fold = (w2 @ b1 + b2).astype(jnp.float32)              # (4,)

    # Pad the sample count only to a multiple of GROUP=32 (required for the free
    # packing reshape).  The batch tile no longer forces padding (see cdiv grid below).
    # TODO(synk): for very large ragged batches, split into an aligned main call plus
    # a tiny padded tail call instead of this full-array jnp.pad (extra HBM pass).
    B_pad = _round_up(max(B, 1), GROUP)
    if B_pad != B:
        x = jnp.pad(x, ((0, B_pad - B), (0, 0)))
    R = B_pad // GROUP
    xp = x.reshape(R, PACK_IN)                               # (R, 256) free view

    # Constant operands, built once and VMEM-resident across all grid steps.
    eye_g = jnp.eye(GROUP, dtype=jnp.float32)
    w_big = jnp.kron(eye_g, w_fold)                                     # (256, 128)
    s_big = jnp.kron(eye_g, jnp.ones((OUT_F, OUT_F), jnp.float32))     # (128, 128)
    b_big = jnp.tile(b_fold, GROUP).reshape(1, PACK_OUT)               # (1, 128)

    # Batch tiling over packed rows.  tbg_max=4096 packed rows == 128K samples ==
    # 4 MiB in + 2 MiB out per grid step (~12.5 MiB double-buffered VMEM): big enough
    # to amortize the ~0.35us/step overhead, small enough for v7x's 64 MiB VMEM and
    # v5e's 16 MiB default scoped limit.  A ragged last tile is handled by Pallas
    # (partial block: OOB reads unspecified, OOB writes dropped; all math here is
    # row-local so garbage tail rows cannot contaminate valid ones).
    tbg_max = max(8, _round_up(tbg_max, 8))
    tb = R if R <= tbg_max else tbg_max
    grid = (pl.cdiv(R, tb),)

    cost = pl.CostEstimate(
        flops=2 * R * PACK_IN * PACK_OUT + 2 * R * PACK_OUT * PACK_OUT,
        transcendentals=2 * R * PACK_OUT,                    # exp + approx reciprocal
        bytes_accessed=4 * (R * (PACK_IN + PACK_OUT)
                            + PACK_IN * PACK_OUT + PACK_OUT * PACK_OUT + PACK_OUT),
    )

    out = pl.pallas_call(
        nn_kernel,
        out_shape=jax.ShapeDtypeStruct((R, PACK_OUT), jnp.float32),
        grid=grid,
        in_specs=[
            pl.BlockSpec((tb, PACK_IN), lambda i: (i, 0)),         # streamed activations
            pl.BlockSpec((PACK_IN, PACK_OUT), lambda i: (0, 0)),   # resident folded weight
            pl.BlockSpec((1, PACK_OUT), lambda i: (0, 0)),         # resident folded bias
            pl.BlockSpec((PACK_OUT, PACK_OUT), lambda i: (0, 0)),  # resident group-sum mat
        ],
        out_specs=pl.BlockSpec((tb, PACK_OUT), lambda i: (i, 0)),
        compiler_params=pltpu.CompilerParams(
            # Independent batch tiles.  NOTE: this is only a scheduling hint; true
            # 2-TensorCore sharding on v7x would need CORE_PARALLEL / a core_map mesh.
            # TODO(synk): evaluate pltpu.CORE_PARALLEL on v7x for very large batches.
            dimension_semantics=("parallel",),
            vmem_limit_bytes=32 * 1024 * 1024,
        ),
        cost_estimate=cost,
    )(xp, w_big, b_big, s_big)

    out = out.reshape(B_pad, OUT_F)                          # free reshape back to (B, 4)
    return out[:B] if B_pad != B else out


def reference_forward(x, w1, b1, w2, b2):
    hi = jax.lax.Precision.HIGHEST
    h = jnp.matmul(x, w1.T, precision=hi) + b1
    logits = jnp.matmul(h, w2.T, precision=hi) + b2
    return jax.nn.softmax(logits, axis=-1)


if __name__ == "__main__":
    key = jax.random.PRNGKey(0)
    k_x, k_w1, k_b1, k_w2, k_b2 = jax.random.split(key, 5)

    # Deterministic parameter init (PyTorch-style uniform bounds for Linear).
    bound1 = 1.0 / jnp.sqrt(8.0)
    w1 = jax.random.uniform(k_w1, (32, 8), jnp.float32, -bound1, bound1)
    b1 = jax.random.uniform(k_b1, (32,), jnp.float32, -bound1, bound1)
    bound2 = 1.0 / jnp.sqrt(32.0)
    w2 = jax.random.uniform(k_w2, (4, 32), jnp.float32, -bound2, bound2)
    b2 = jax.random.uniform(k_b2, (4,), jnp.float32, -bound2, bound2)

    # Tolerances allow for MXU bf16-pass rounding in default-precision matmuls plus
    # the approximate (EUP) reciprocal used for the softmax normalization.
    ATOL = RTOL = 5e-3

    # Case 1: tiny batch of LunarLander observations (pads 8 -> 32 samples,
    # single packed row, single grid step).
    x_small = jax.random.normal(k_x, (8, 8), dtype=jnp.float32)
    out_small = jax.block_until_ready(nn_forward(x_small, w1, b1, w2, b2))
    ref_small = reference_forward(x_small, w1, b1, w2, b2)
    assert out_small.shape == (8, 4)
    assert jnp.allclose(out_small, ref_small, atol=ATOL, rtol=RTOL)
    assert jnp.allclose(jnp.sum(out_small, axis=-1), 1.0, atol=5e-3)

    # Case 2: ragged batch (pads 40 -> 64 samples, 2 packed rows, single grid step).
    x_mid = jax.random.normal(k_x, (40, 8), dtype=jnp.float32)
    out_mid = jax.block_until_ready(nn_forward(x_mid, w1, b1, w2, b2))
    ref_mid = reference_forward(x_mid, w1, b1, w2, b2)
    assert out_mid.shape == (40, 4)
    assert jnp.allclose(out_mid, ref_mid, atol=ATOL, rtol=RTOL)

    # Case 3: multi-step pipelined grid with a ragged last tile (1280 samples ->
    # 40 packed rows, tile of 16 rows -> grid of 3 with a partial final block;
    # no batch padding needed).
    x_big = jax.random.normal(k_x, (1280, 8), dtype=jnp.float32)
    out_big = jax.block_until_ready(nn_forward(x_big, w1, b1, w2, b2, tbg_max=16))
    ref_big = reference_forward(x_big, w1, b1, w2, b2)
    assert out_big.shape == (1280, 4)
    assert jnp.allclose(out_big, ref_big, atol=ATOL, rtol=RTOL)
    assert jnp.allclose(jnp.sum(out_big, axis=-1), 1.0, atol=5e-3)

    print("KERNEL_OK")
</pallas_src>

<mosaic_0001>
module attributes {stable_mosaic.version = 11 : i64} {
  func.func @nn_kernel(%arg0: i32, %arg1: memref<1x256xf32, #tpu.memory_space<vmem>>, %arg2: memref<256x128xf32, #tpu.memory_space<vmem>>, %arg3: memref<1x128xf32, #tpu.memory_space<vmem>>, %arg4: memref<128x128xf32, #tpu.memory_space<vmem>>, %arg5: memref<1x128xf32, #tpu.memory_space<vmem>>) attributes {dimension_semantics = [#tpu.dimension_semantics<parallel>], iteration_bounds = array<i64: 1>, scalar_prefetch = 0 : i64, scratch_operands = 0 : i64, tpu.core_type = #tpu.core_type<tc>, window_params = [{transform_indices = @transform_0, window_bounds = array<i64: 1, 256>}, {pipeline_mode = #tpu.pipeline_mode<synchronous>, transform_indices = @transform_1, window_bounds = array<i64: 256, 128>}, {pipeline_mode = #tpu.pipeline_mode<synchronous>, transform_indices = @transform_2, window_bounds = array<i64: 1, 128>}, {pipeline_mode = #tpu.pipeline_mode<synchronous>, transform_indices = @transform_3, window_bounds = array<i64: 128, 128>}, {transform_indices = @transform_4, window_bounds = array<i64: 1, 128>}]} {
    %c0 = arith.constant 0 : index
    %c0_0 = arith.constant 0 : index
    %0 = vector.load %arg1[%c0, %c0_0] : memref<1x256xf32, #tpu.memory_space<vmem>>, vector<1x256xf32>
    %c0_1 = arith.constant 0 : index
    %c0_2 = arith.constant 0 : index
    %1 = vector.load %arg2[%c0_1, %c0_2] : memref<256x128xf32, #tpu.memory_space<vmem>>, vector<256x128xf32>
    %cst = arith.constant dense<0.000000e+00> : vector<1x128xf32>
    %2 = tpu.matmul %0, %1, %cst {dimension_numbers = #tpu.dot_dimension_numbers<[1], [0], [0], [1], [0, 0, 1, 1], [], []>} : vector<1x256xf32>, vector<256x128xf32>, vector<1x128xf32> -> vector<1x128xf32>
    %c0_3 = arith.constant 0 : index
    %c0_4 = arith.constant 0 : index
    %3 = vector.load %arg3[%c0_3, %c0_4] : memref<1x128xf32, #tpu.memory_space<vmem>>, vector<1x128xf32>
    %4 = arith.addf %2, %3 : vector<1x128xf32>
    %cst_5 = arith.constant dense<0xFF800000> : vector<1xf32>
    %5 = vector.multi_reduction <maximumf>, %4, %cst_5 [1] : vector<1x128xf32> to vector<1xf32>
    %6 = vector.shape_cast %5 : vector<1xf32> to vector<1x1xf32>
    %7 = vector.broadcast %6 : vector<1x1xf32> to vector<1x128xf32>
    %8 = arith.subf %4, %7 : vector<1x128xf32>
    %cst_6 = arith.constant -6.000000e+01 : f32
    %9 = vector.broadcast %cst_6 : f32 to vector<1x128xf32>
    %10 = arith.maximumf %8, %9 : vector<1x128xf32>
    %11 = math.exp %10 : vector<1x128xf32>
    %c0_7 = arith.constant 0 : index
    %c0_8 = arith.constant 0 : index
    %12 = vector.load %arg4[%c0_7, %c0_8] : memref<128x128xf32, #tpu.memory_space<vmem>>, vector<128x128xf32>
    %cst_9 = arith.constant dense<0.000000e+00> : vector<1x128xf32>
    %13 = tpu.matmul %11, %12, %cst_9 {dimension_numbers = #tpu.dot_dimension_numbers<[1], [0], [0], [1], [0, 0, 1, 1], [], []>} : vector<1x128xf32>, vector<128x128xf32>, vector<1x128xf32> -> vector<1x128xf32>
    %14 = tpu.reciprocal %13 {approx = true} : vector<1x128xf32> -> vector<1x128xf32>
    %15 = arith.mulf %11, %14 : vector<1x128xf32>
    %c0_10 = arith.constant 0 : index
    %c0_11 = arith.constant 0 : index
    %16 = vector.load %arg5[%c0_10, %c0_11] : memref<1x128xf32, #tpu.memory_space<vmem>>, vector<1x128xf32>
    tpu.vector_store %arg5[%c0_10, %c0_11], %15 {strides = array<i32>} : memref<1x128xf32, #tpu.memory_space<vmem>>, vector<1x128xf32>,
    return
  }
  func.func @transform_0(%arg0: i32) -> (i32, i32) {
    %c0_i32 = arith.constant 0 : i32
    %c0_i32_0 = arith.constant 0 : i32
    return %arg0, %c0_i32 : i32, i32
  }
  func.func @transform_1(%arg0: i32) -> (i32, i32) {
    %c0_i32 = arith.constant 0 : i32
    %c0_i32_0 = arith.constant 0 : i32
    %c0_i32_1 = arith.constant 0 : i32
    return %c0_i32, %c0_i32_0 : i32, i32
  }
  func.func @transform_2(%arg0: i32) -> (i32, i32) {
    %c0_i32 = arith.constant 0 : i32
    %c0_i32_0 = arith.constant 0 : i32
    %c0_i32_1 = arith.constant 0 : i32
    return %c0_i32, %c0_i32_0 : i32, i32
  }
  func.func @transform_3(%arg0: i32) -> (i32, i32) {
    %c0_i32 = arith.constant 0 : i32
    %c0_i32_0 = arith.constant 0 : i32
    %c0_i32_1 = arith.constant 0 : i32
    return %c0_i32, %c0_i32_0 : i32, i32
  }
  func.func @transform_4(%arg0: i32) -> (i32, i32) {
    %c0_i32 = arith.constant 0 : i32
    %c0_i32_0 = arith.constant 0 : i32
    return %arg0, %c0_i32 : i32, i32
  }
}

</mosaic_0001>

<bundles_post_ra>
// kernel: tpu_custom_call.1
= control target key start
LH: loop header
LB: loop body
LE: loop exit
PB: predicated region body
PF: predicated region fallthrough
CT: control target
= control target key end

     0   :  { %9 = vsyncpa [#allocation3], 0  ;;  %s626_s0 = inlined_call_operand.hbm [shape: f32[1,256], index: 0, kind: input, shape index: {}]   ;;  %s627_s1 = inlined_call_operand.hbm [shape: f32[256,128], index: 1, kind: input, shape index: {}]   ;;  %s628_s2 = inlined_call_operand.vmem [shape: f32[1,128], index: 2, kind: input, shape index: {}]   ;;  %s629_s3 = inlined_call_operand.hbm [shape: f32[128,128], index: 3, kind: input, shape index: {}]   ;;  %s630_s4 = inlined_call_operand.hbm [shape: f32[1,128], index: 4, kind: output, shape index: {}]  }
   0x1   :  { %10 = vsyncpa [#allocation6], 0 }
   0x2   :  { %11 = vsyncpa [#allocation4], 0  ;;  %s535_s15 = smov [#allocation5]   ;;  %s441_s19 = scalar_lea.hbm %s627_s1, 4096 }
   0x3   :  { %s27_s16 = sshll.u32 %s535_s15, 4  ;;  %p442_p0 = scmp.ne.s32.totalorder %s627_s1, %s441_s19  ;;  %s28_s16 = int_to_ptr.vmem [resolvable:$true] %s27_s16 }
   0x4   :  { %p445_p1 = scmp.lt.u32.totalorder %s441_s19, %s627_s1 }
   0x6   :  { %p447_p2 = pnand %p445_p1, %p442_p0 }
   0x8   :  { %450 = shalt.err (!%p447_p2)
}
   0x9   :  { %s451_s24 = scalar_lea.vmem %s28_s16, 4096  ;;  %p456_p4 = scmp.lt.s32.totalorder %s28_s16, %s28_s16 }
   0xa   :  { %p452_p3 = scmp.ne.s32.totalorder %s28_s16, %s451_s24  ;;  %p457_p5 = scmp.lt.s32.totalorder %s451_s24, %s451_s24 }
   0xc   :  { %p458_p6 = por %p457_p5, %p456_p4 }
   0xe   :  { %p459_p7 = pnand %p458_p6, %p452_p3 }
  0x10   :  { %462 = shalt.err (!%p459_p7)
}
  0x11   :  { %s536_s25 = smov 128   ;;  %s537_s26 = smov 8  }
  0x12   :  { %33 = dma.hbm_to_vmem [thread:$0]  %s627_s1, 4096, %s28_s16, [#allocation6], %s536_s25, %s536_s25, %s537_s26  }
  0x13   :  { %s538_s29 = smov [#allocation2]   ;;  %s539_s5 = smov [#allocation7]  }
  0x14   :  { %s18_s30 = sshll.u32 %s538_s29, 4  ;;  %s41_s6 = sshll.u32 %s539_s5, 4  ;;  %s19_s30 = int_to_ptr.vmem [resolvable:$true] %s18_s30  ;;  %s42_s6 = int_to_ptr.vmem [resolvable:$true] %s41_s6 }
  0x15   :  { %s463_s9 = scalar_lea.hbm %s626_s0, 32 }
  0x16   :  { %p464_p8 = scmp.ne.s32.totalorder %s626_s0, %s463_s9  ;;  %p467_p9 = scmp.lt.u32.totalorder %s463_s9, %s626_s0 }
  0x18   :  { %p469_p10 = pnand %p467_p9, %p464_p8 }
  0x1a   :  { %472 = shalt.err (!%p469_p10)
}
  0x1b   :  { %s473_s1 = scalar_lea.vmem %s19_s30, 32  ;;  %p478_p12 = scmp.lt.s32.totalorder %s19_s30, %s19_s30 }
  0x1c   :  { %p474_p11 = scmp.ne.s32.totalorder %s19_s30, %s473_s1  ;;  %p479_p13 = scmp.lt.s32.totalorder %s473_s1, %s473_s1 }
  0x1e   :  { %p480_p0 = por %p479_p13, %p478_p12 }
  0x20   :  { %p481_p1 = pnand %p480_p0, %p474_p11 }
  0x22   :  { %484 = shalt.err (!%p481_p1)
}
  0x23   :  { %21 = dma.hbm_to_vmem [thread:$0]  %s626_s0, 32, %s19_s30, [#allocation3]  }
  0x24   :  { %s485_s18 = scalar_lea.hbm %s629_s3, 2048 }
  0x25   :  { %p486_p2 = scmp.ne.s32.totalorder %s629_s3, %s485_s18  ;;  %p489_p3 = scmp.lt.u32.totalorder %s485_s18, %s629_s3 }
  0x27   :  { %p491_p4 = pnand %p489_p3, %p486_p2 }
  0x29   :  { %494 = shalt.err (!%p491_p4)
}
  0x2a   :  { %s495_s23 = scalar_lea.vmem %s42_s6, 2048  ;;  %p500_p6 = scmp.lt.s32.totalorder %s42_s6, %s42_s6 }
  0x2b   :  { %p496_p5 = scmp.ne.s32.totalorder %s42_s6, %s495_s23  ;;  %p501_p7 = scmp.lt.s32.totalorder %s495_s23, %s495_s23 }
  0x2d   :  { %p502_p8 = por %p501_p7, %p500_p6 }
  0x2f   :  { %p503_p9 = pnand %p502_p8, %p496_p5 }
  0x31   :  { %506 = shalt.err (!%p503_p9)
}
  0x32   :  { %47 = dma.hbm_to_vmem [thread:$0]  %s629_s3, 2048, %s42_s6, [#allocation6], %s536_s25, %s536_s25, %s537_s26  }
  0x33   :  { %529 = dma.done.wait [#allocation3], 32  }
  0x34   :  { %530 = vsyncadd [#allocation3], 4294967264 }
  0x35   :  { %531 = dma.done.wait [#allocation6], 6144  }
  0x36   :  { %532 = vsyncadd [#allocation6], 4294961152  ;;  %v92_v0 = vlaneseq  ;;  %v74_v1 = vld [vmem:[#allocation5 + $0x80] sm:$0xff]  ;;  %v75_v2 = vld [vmem:[#allocation5 + $0x88] sm:$0xff]  ;;  %v540_v58 = vmov 0.0|0.0   ;;  %vm172_vm0 = vcmask 1040384  }
  0x37   :  { %v58_v3 = vld [vmem:[#allocation5] sm:$0xff]  ;;  %v372_v4 = vpack.c.bf16 %v75_v2, %v74_v1  ;;  %v59_v5 = vld [vmem:[#allocation5 + $0x8] sm:$0xff]  ;;  %v76_v6 = vld [vmem:[#allocation5 + $0x90] sm:$0xff]  ;;  %404 = vmatprep.subr.bf16.mxu1 %v540_v58  ;;  %vm541_vm1 = vmmov 0  }
  0x38   :  { %v77_v7 = vld [vmem:[#allocation5 + $0x98] sm:$0xff]  ;;  %v374_v8 = vpack.c.bf16 %v59_v5, %v58_v3  ;;  %v60_v10 = vld [vmem:[#allocation5 + $0x10] sm:$0xff]  ;;  %v78_v12 = vld [vmem:[#allocation5 + $0xa0] sm:$0xff]  ;;  %v93_v14 = vshrl.u32 %v92_v0, 7 }
  0x39   :  { %v376_v9 = vpack.c.bf16 %v77_v7, %v76_v6  ;;  %v61_v11 = vld [vmem:[#allocation5 + $0x18] sm:$0xff]  ;;  %373 = vmatprep.subr.bf16.mxu0 %v372_v4  ;;  %v79_v13 = vld [vmem:[#allocation5 + $0xa8] sm:$0xff]  ;;  %v62_v17 = vld [vmem:[#allocation5 + $0x20] sm:$0xff] }
  0x3a   :  { %375 = vmatpush3.bf16.msra.mxu0 %v374_v8  ;;  %v378_v15 = vpack.c.bf16 %v61_v11, %v60_v10  ;;  %v380_v16 = vpack.c.bf16 %v79_v13, %v78_v12  ;;  %v63_v18 = vld [vmem:[#allocation5 + $0x28] sm:$0xff]  ;;  %v80_v19 = vld [vmem:[#allocation5 + $0xb0] sm:$0xff]  ;;  %v81_v20 = vld [vmem:[#allocation5 + $0xb8] sm:$0xff]  ;;  %v98_v21 = vsub.s32 1, %v93_v14  ;;  %v94_v52 = vsub.s32 0, %v93_v14 }
  0x3b   :  { %377 = vmatprep.subr.bf16.mxu0 %v376_v9  ;;  %v382_v22 = vpack.c.bf16 %v63_v18, %v62_v17  ;;  %v384_v23 = vpack.c.bf16 %v81_v20, %v80_v19  ;;  %v64_v24 = vld [vmem:[#allocation5 + $0x30] sm:$0xff]  ;;  %v65_v25 = vld [vmem:[#allocation5 + $0x38] sm:$0xff]  ;;  %v82_v26 = vld [vmem:[#allocation5 + $0xc0] sm:$0xff] }
  0x3c   :  { %v83_v27 = vld [vmem:[#allocation5 + $0xc8] sm:$0xff]  ;;  %v57_v28 = vld [vmem:[#allocation2] sm:$0x3]  ;;  %v386_v30 = vpack.c.bf16 %v65_v25, %v64_v24  ;;  %v66_v32 = vld [vmem:[#allocation5 + $0x40] sm:$0xff] }
  0x3d   :  { %v99_v29 = vrot.slane %v57_v28, %v98_v21  ;;  %v388_v31 = vpack.c.bf16 %v83_v27, %v82_v26  ;;  %v67_v33 = vld [vmem:[#allocation5 + $0x48] sm:$0xff]  ;;  %v84_v34 = vld [vmem:[#allocation5 + $0xd0] sm:$0xff]  ;;  %v85_v35 = vld [vmem:[#allocation5 + $0xd8] sm:$0xff]  ;;  %v95_v54 = vrot.slane %v57_v28, %v94_v52  ;;  %v542_v21 = vmov 0.0  }
  0x3e   :  { %379 = vmatpush3.bf16.msra.mxu0 %v378_v15  ;;  %v390_v36 = vpack.c.bf16 %v67_v33, %v66_v32  ;;  %v392_v37 = vpack.c.bf16 %v85_v35, %v84_v34  ;;  %v68_v38 = vld [vmem:[#allocation5 + $0x50] sm:$0xff]  ;;  %v69_v39 = vld [vmem:[#allocation5 + $0x58] sm:$0xff]  ;;  %v86_v40 = vld [vmem:[#allocation5 + $0xe0] sm:$0xff]  ;;  %369 = vmatprep.mubr.msk.f32.mxu1 %vm541_vm1, %v542_v21 }
  0x3f   :  { %381 = vmatprep.subr.bf16.mxu0 %v380_v16  ;;  %166 = vmatprep.mubr.f32.mxu0 %v99_v29  ;;  %v87_v41 = vld [vmem:[#allocation5 + $0xe8] sm:$0xff]  ;;  %v394_v42 = vpack.c.bf16 %v69_v39, %v68_v38  ;;  %v70_v44 = vld [vmem:[#allocation5 + $0x60] sm:$0xff]  ;;  %v88_v46 = vld [vmem:[#allocation5 + $0xf0] sm:$0xff] }
  0x40   :  { %v396_v43 = vpack.c.bf16 %v87_v41, %v86_v40  ;;  %v71_v45 = vld [vmem:[#allocation5 + $0x68] sm:$0xff]  ;;  %v89_v47 = vld [vmem:[#allocation5 + $0xf8] sm:$0xff]  ;;  %v72_v50 = vld [vmem:[#allocation5 + $0x70] sm:$0xff] }
  0x41   :  { %v398_v48 = vpack.c.bf16 %v71_v45, %v70_v44  ;;  %v400_v49 = vpack.c.bf16 %v89_v47, %v88_v46  ;;  %v73_v51 = vld [vmem:[#allocation5 + $0x78] sm:$0xff]  ;;  %v180_v55 = vld [vmem:[#allocation7] sm:$0xff]  ;;  %v181_v56 = vld [vmem:[#allocation7 + $0x8] sm:$0xff] }
  0x42   :  { %383 = vmatpush3.bf16.msra.mxu0 %v382_v22  ;;  %v402_v53 = vpack.c.bf16 %v73_v51, %v72_v50  ;;  %v182_v57 = vld [vmem:[#allocation7 + $0x10] sm:$0xff]  ;;  %v405_v59 = vpack.c.bf16 %v181_v56, %v180_v55  ;;  %v183_v60 = vld [vmem:[#allocation7 + $0x18] sm:$0xff]  ;;  %v184_v62 = vld [vmem:[#allocation7 + $0x20] sm:$0xff] }
  0x43   :  { %385 = vmatprep.subr.bf16.mxu0 %v384_v23  ;;  %v408_v61 = vpack.c.bf16 %v183_v60, %v182_v57  ;;  %v185_v63 = vld [vmem:[#allocation7 + $0x28] sm:$0xff]  ;;  %v186_v1 = vld [vmem:[#allocation7 + $0x30] sm:$0xff]  ;;  %v187_v2 = vld [vmem:[#allocation7 + $0x38] sm:$0xff] }
  0x44   :  { %406 = vmatpush3.bf16.msra.mxu1 %v405_v59  ;;  %v411_v0 = vpack.c.bf16 %v185_v63, %v184_v62  ;;  %v414_v3 = vpack.c.bf16 %v187_v2, %v186_v1  ;;  %v90_v6 = vld [vmem:[%s628_s2] sm:$0x1]  ;;  %v188_v10 = vld [vmem:[#allocation7 + $0x40] sm:$0xff]  ;;  %v189_v11 = vld [vmem:[#allocation7 + $0x48] sm:$0xff]  ;;  %s543_s2 = smov [#allocation8]  }
  0x45   :  { %407 = vmatprep.subr.bf16.mxu1 %v540_v58  ;;  %v417_v12 = vpack.c.bf16 %v189_v11, %v188_v10  ;;  %v190_v13 = vld [vmem:[#allocation7 + $0x50] sm:$0xff]  ;;  %v191_v14 = vld [vmem:[#allocation7 + $0x58] sm:$0xff]  ;;  %v192_v16 = vld [vmem:[#allocation7 + $0x60] sm:$0xff]  ;;  %s275_s26 = sshll.u32 %s543_s2, 4  ;;  %s276_s26 = int_to_ptr.vmem [resolvable:$true] %s275_s26 }
  0x46   :  { %387 = vmatpush3.bf16.msra.mxu0 %v386_v30  ;;  %v420_v15 = vpack.c.bf16 %v191_v14, %v190_v13  ;;  %v193_v17 = vld [vmem:[#allocation7 + $0x68] sm:$0xff]  ;;  %v194_v19 = vld [vmem:[#allocation7 + $0x70] sm:$0xff]  ;;  %v195_v20 = vld [vmem:[#allocation7 + $0x78] sm:$0xff]  ;;  %s507_s27 = scalar_lea.vmem %s276_s26, 16  ;;  %s511_s28 = scalar_lea.vmem %s276_s26, 32 }
  0x47   :  { %389 = vmatprep.subr.bf16.mxu0 %v388_v31  ;;  %v423_v18 = vpack.c.bf16 %v193_v17, %v192_v16  ;;  %v426_v22 = vpack.c.bf16 %v195_v20, %v194_v19  ;;  %p508_p10 = scmp.ne.s32.totalorder %s276_s26, %s507_s27  ;;  %p512_p11 = scmp.lt.s32.totalorder %s276_s26, %s276_s26 }
  0x48   :  { %409 = vmatpush3.bf16.msra.mxu1 %v408_v61  ;;  %p513_p12 = scmp.lt.s32.totalorder %s511_s28, %s507_s27 }
  0x49   :  { %410 = vmatprep.subr.bf16.mxu1 %v540_v58 }
  0x4a   :  { %391 = vmatpush3.bf16.msra.mxu0 %v390_v36  ;;  %p514_p13 = por %p513_p12, %p512_p11 }
  0x4b   :  { %393 = vmatprep.subr.bf16.mxu0 %v392_v37 }
  0x4c   :  { %412 = vmatpush3.bf16.msra.mxu1 %v411_v0  ;;  %p515_p0 = pnand %p514_p13, %p508_p10 }
  0x4d   :  { %413 = vmatprep.subr.bf16.mxu1 %v540_v58 }
  0x4e   :  { %395 = vmatpush3.bf16.msra.mxu0 %v394_v42 }
  0x4f   :  { %397 = vmatprep.subr.bf16.mxu0 %v396_v43 }
  0x50   :  { %415 = vmatpush3.bf16.msra.mxu1 %v414_v3 }
  0x51   :  { %416 = vmatprep.subr.bf16.mxu1 %v540_v58 }
  0x52   :  { %399 = vmatpush3.bf16.msra.mxu0 %v398_v48 }
  0x53   :  { %401 = vmatprep.subr.bf16.mxu0 %v400_v49 }
  0x54   :  { %418 = vmatpush3.bf16.msra.mxu1 %v417_v12 }
  0x55   :  { %419 = vmatprep.subr.bf16.mxu1 %v540_v58 }
  0x56   :  { %403 = vmatpush3.bf16.msra.mxu0 %v402_v53 }
  0x58   :  { %421 = vmatpush3.bf16.msra.mxu1 %v420_v15 }
  0x59   :  { %167 = vmatmul.mubr.f32.vlgmr.msra.gmra.mrb[0].mxu0 %v95_v54  ;;  %422 = vmatprep.subr.bf16.mxu1 %v540_v58 }
  0x5c   :  { %424 = vmatpush3.bf16.msra.mxu1 %v423_v18 }
  0x5d   :  { %425 = vmatprep.subr.bf16.mxu1 %v540_v58 }
  0x60   :  { %427 = vmatpush3.bf16.msra.mxu1 %v426_v22 }
 0x12c   :  { %v317_v4 = vpop.f32.mrb[0].mxu0 }
 0x12d   :  { %v318_v5 = vpop.f32.mrb[1].mxu0 }
 0x12e   :  { %v319_v7 = vadd.f32 %v318_v5, %v317_v4 }
 0x130   :  { %v169_v8 = vadd.f32 %v319_v7, %v90_v6 }
 0x132   :  { %v173_v9 = vsel %vm172_vm0, %v169_v8, -inf }
 0x133   :  { %174 = vmax.xlane.f32.xlu0 %v173_v9 }
 0x1c0   :  { %v175_v23 = vpop.xlane.xlu0 %174 }
 0x1c1   :  { %v176_v24 = vsub.f32 %v169_v8, %v175_v23 }
 0x1c3   :  { %v177_v25 = vmax.f32 %v176_v24, -60.0 }
 0x1c5   :  { %v178_v26 = vmul.f32 1.442695, %v177_v25 }
 0x1c7   :  { %437 = vpow2.f32 %v178_v26 }
 0x1d1   :  { %v438_v27 = vpop.eup %437 }
 0x1d2   :  { %370 = vmatmul.mubr.f32.vlgmr.msra.gmra.mrb[0].mxu1 %v438_v27 }
 0x2a5   :  { %v262_v28 = vpop.f32.mrb[0].mxu1 }
 0x2a6   :  { %439 = vrcp.f32 %v262_v28  ;;  %v371_v29 = vpop.f32.mrb[1].mxu1 }
 0x2b0   :  { %v440_v30 = vpop.eup %439 }
 0x2b1   :  { %v267_v31 = vmul.f32 %v440_v30, %v438_v27 }
 0x2b3   :  { %268 = vst [vmem:[#allocation8] sm:$0x1] %v267_v31 }
 0x2b4   :  { %518 = shalt.err (!%p515_p0)
}
 0x2b5   :  { %s519_s5 = scalar_lea.hbm %s630_s4, 16 }
 0x2b6   :  { %p520_p1 = scmp.ne.s32.totalorder %s630_s4, %s519_s5  ;;  %p523_p2 = scmp.lt.u32.totalorder %s519_s5, %s630_s4 }
 0x2b8   :  { %p525_p3 = pnand %p523_p2, %p520_p1 }
 0x2ba   :  { %528 = shalt.err (!%p525_p3)
}
 0x2bb   :  { %278 = dma.vmem_to_hbm [thread:$0]  %s276_s26, 16, %s630_s4, [#allocation4]  }
 0x2bc   :  { %533 = dma.done.wait [#allocation4], 16  }
 0x2bd   :  { %534 = vsyncadd [#allocation4], 4294967280 }
 0x2be   :  { %282 = vsyncpa [#allocation3], 1 }
 0x2bf   :  { %283 = vsyncpa [#allocation6], 1 }
 0x2c0   :  { %284 = vsyncpa [#allocation4], 1 }

</bundles_post_ra>
